<compile_context>
chip_gen: v6e
topology: v6e:2x2x1
jax: 0.10.0
libtpu: 0.0.40
codegen_flags: <defaults>
</compile_context>

<pallas_src>
import math

import jax
import jax.numpy as jnp
from jax.experimental import pallas as pl
from jax.experimental.pallas import tpu as pltpu


WINDOW = 16                                  # outstanding row DMAs per grid step
MAX_TOKEN_BLOCK = 512                        # rows gathered per grid step (cap)
OUT_BLOCK_BYTES_BUDGET = 4 * 1024 * 1024     # per output block (x2 double-buffered)
VMEM_TABLE_BYTES_BUDGET = 8 * 1024 * 1024    # fast path: table resident in VMEM
VMEM_LIMIT_BYTES = 32 * 1024 * 1024          # safe on v5e/v6e (128 MiB) and v7x (64 MiB)


def _embedding_gather_kernel(idx_ref, w_ref, o_ref, sem):
    """Gathers o_ref.shape[0] embedding rows for this grid step.

    idx_ref: (NT_padded,) int32 in SMEM (scalar prefetch).
    w_ref:   (V, D) embedding table; HBM ref (pl.ANY) or VMEM-resident block.
    o_ref:   (token_block, D) output block in VMEM.
    sem:     (WINDOW,) DMA completion semaphores (sliding-window pool).
    """
    tb = o_ref.shape[0]
    w = min(WINDOW, tb)                      # static window depth
    base = pl.program_id(0) * tb

    def row_copy(j):
        # Rebuilt identically for start() and wait(): same src row, dst row, sem.
        row = idx_ref[base + j]
        return pltpu.make_async_copy(
            w_ref.at[pl.ds(row, 1), :],
            o_ref.at[pl.ds(j, 1), :],
            sem.at[j % w],
        )

    # Prime the window.
    @pl.loop(0, w)
    def _(j):
        row_copy(j).start()

    # Steady state: retire the oldest in-flight row, then issue the next one
    # (issue-ahead / wait-behind keeps `w` row DMAs in flight).
    @pl.loop(w, tb)
    def _(j):
        row_copy(j - w).wait()
        row_copy(j).start()

    # Drain the remaining in-flight rows before the block is written back.
    @pl.loop(tb - w, tb)
    def _(j):
        row_copy(j).wait()


def _choose_token_block(nt, d, itemsize):
    rows_by_vmem = max(8, OUT_BLOCK_BYTES_BUDGET // max(1, d * itemsize))
    tb = min(MAX_TOKEN_BLOCK, rows_by_vmem)
    tb = min(tb, pl.cdiv(nt, 8) * 8)         # don't exceed the (8-rounded) problem
    tb = max(8, (tb // 8) * 8)               # multiple of 8 sublanes
    return int(tb)


def word_embedding(x, w_embed, *, force_hbm_table=False):
    """x: (N, T) integer indices, w_embed: (V, D). Returns (N, T, D)."""
    n, t = x.shape
    v, d = w_embed.shape
    nt = n * t
    itemsize = w_embed.dtype.itemsize

    # Contract: 0 <= idx < V (PyTorch nn.Embedding raises; we clamp so a bad
    # index can never drive an out-of-bounds HBM DMA).
    idx = jnp.clip(x.reshape(nt).astype(jnp.int32), 0, v - 1)

    tb = _choose_token_block(nt, d, itemsize)
    nt_padded = pl.cdiv(nt, tb) * tb
    if nt_padded != nt:
        idx = jnp.concatenate([idx, jnp.zeros((nt_padded - nt,), jnp.int32)])

    # Fast path: small tables stay resident in VMEM (row copies become local
    # VMEM->VMEM DMAs).  Large tables stay in HBM and are gathered row-by-row.
    table_in_vmem = (v * d * itemsize <= VMEM_TABLE_BYTES_BUDGET) and not force_hbm_table
    if table_in_vmem:
        w_spec = pl.BlockSpec((v, d), lambda i, idx_ref: (0, 0))
    else:
        w_spec = pl.BlockSpec(memory_space=pl.ANY)

    grid_spec = pltpu.PrefetchScalarGridSpec(
        num_scalar_prefetch=1,
        grid=(nt_padded // tb,),
        in_specs=[w_spec],
        out_specs=pl.BlockSpec((tb, d), lambda i, idx_ref: (i, 0)),
        scratch_shapes=[pltpu.SemaphoreType.DMA((WINDOW,))],
    )

    out = pl.pallas_call(
        _embedding_gather_kernel,
        out_shape=jax.ShapeDtypeStruct((nt_padded, d), w_embed.dtype),
        grid_spec=grid_spec,
        compiler_params=pltpu.CompilerParams(
            dimension_semantics=("parallel",),   # independent token blocks
            vmem_limit_bytes=VMEM_LIMIT_BYTES,
        ),
        cost_estimate=pl.CostEstimate(
            flops=0,
            transcendentals=0,
            bytes_accessed=int(2 * nt_padded * d * itemsize + nt_padded * 4),
        ),
    )(idx, w_embed)

    return out[:nt].reshape(n, t, d)


if __name__ == "__main__":
    # Small shapes consistent with the module: N=2, T=8, V=32, D=32.
    N, T, V, D = 2, 8, 32, 32

    key = jax.random.PRNGKey(0)
    k_w, k_x = jax.random.split(key)

    # Deterministic parameter init mirroring torch.randn(V, D) / sqrt(V).
    w_embed = jax.random.normal(k_w, (V, D), dtype=jnp.float32) / math.sqrt(V)
    x = jax.random.randint(k_x, (N, T), minval=0, maxval=V, dtype=jnp.int32)

    ref = w_embed[x]

    # Default dispatch: table fits VMEM -> VMEM-resident fast path.
    out = jax.block_until_ready(word_embedding(x, w_embed))
    assert out.shape == (N, T, D)
    assert jnp.allclose(out, ref, atol=1e-6), "mismatch vs reference (VMEM fast path)"

    # Also exercise the large-table path (table kept in HBM, per-row HBM DMAs).
    out_hbm = jax.block_until_ready(word_embedding(x, w_embed, force_hbm_table=True))
    assert jnp.allclose(out_hbm, ref, atol=1e-6), "mismatch vs reference (HBM gather path)"

    print("KERNEL_OK")
</pallas_src>

<mosaic_0001>
module attributes {stable_mosaic.version = 11 : i64} {
  func.func @_embedding_gather_kernel(%arg0: i32, %arg1: memref<16xi32, #tpu.memory_space<smem>>, %arg2: memref<32x32xf32, #tpu.memory_space<vmem>>, %arg3: memref<16x32xf32, #tpu.memory_space<vmem>>, %arg4: memref<16x!tpu.dma_semaphore, #tpu.memory_space<semaphore_mem>>) attributes {dimension_semantics = [#tpu.dimension_semantics<parallel>], iteration_bounds = array<i64: 1>, scalar_prefetch = 1 : i64, scratch_operands = 1 : i64, tpu.core_type = #tpu.core_type<tc>, window_params = [{pipeline_mode = #tpu.pipeline_mode<synchronous>, transform_indices = @transform_0, window_bounds = array<i64: 32, 32>}, {transform_indices = @transform_1, window_bounds = array<i64: 16, 32>}]} {
    %c16_i32 = arith.constant 16 : i32
    %0 = arith.muli %arg0, %c16_i32 : i32
    %c0_i32 = arith.constant 0 : i32
    %c16_i32_0 = arith.constant 16 : i32
    %1 = arith.addi %c0_i32, %c16_i32_0 : i32
    %c1_i32 = arith.constant 1 : i32
    scf.for %arg5 = %c0_i32 to %1 step %c1_i32  : i32 {
      %c1_i32_10 = arith.constant 1 : i32
      %4 = arith.muli %arg5, %c1_i32_10 : i32
      %c0_i32_11 = arith.constant 0 : i32
      %5 = arith.addi %c0_i32_11, %4 : i32
      %6 = arith.addi %0, %5 : i32
      %7 = arith.index_cast %6 : i32 to index
      %8 = memref.load %arg1[%7] : memref<16xi32, #tpu.memory_space<smem>>
      %c16_i32_12 = arith.constant 16 : i32
      %c0_i32_13 = arith.constant 0 : i32
      %9 = arith.cmpi eq, %c16_i32_12, %c0_i32_13 : i32
      %c1_i32_14 = arith.constant 1 : i32
      %10 = arith.select %9, %c1_i32_14, %c16_i32_12 : i32
      %11 = arith.remsi %5, %10 : i32
      %c0_i32_15 = arith.constant 0 : i32
      %12 = arith.cmpi ne, %11, %c0_i32_15 : i32
      %c0_i32_16 = arith.constant 0 : i32
      %13 = arith.cmpi slt, %11, %c0_i32_16 : i32
      %c0_i32_17 = arith.constant 0 : i32
      %14 = arith.cmpi slt, %10, %c0_i32_17 : i32
      %15 = arith.xori %13, %14 : i1
      %16 = arith.andi %15, %12 : i1
      %17 = arith.addi %11, %10 : i32
      %18 = arith.select %16, %17, %11 : i32
      %c0_i32_18 = arith.constant 0 : i32
      %19 = tpu.memref_slice %arg2[%8, %c0_i32_18] : memref<32x32xf32, #tpu.memory_space<vmem>> -> memref<1x32xf32, #tpu.memory_space<vmem>>
      %c0_i32_19 = arith.constant 0 : i32
      %20 = tpu.memref_slice %arg3[%5, %c0_i32_19] : memref<16x32xf32, #tpu.memory_space<vmem>> -> memref<1x32xf32, #tpu.memory_space<vmem>>
      %21 = tpu.memref_slice %arg4[%18] : memref<16x!tpu.dma_semaphore, #tpu.memory_space<semaphore_mem>> -> memref<1x!tpu.dma_semaphore, #tpu.memory_space<semaphore_mem>>
      %22 = tpu.memref_squeeze %21 : memref<1x!tpu.dma_semaphore, #tpu.memory_space<semaphore_mem>> -> memref<!tpu.dma_semaphore, #tpu.memory_space<semaphore_mem>>
      tpu.enqueue_dma source(%19 : memref<1x32xf32, #tpu.memory_space<vmem>>) target(%20 : memref<1x32xf32, #tpu.memory_space<vmem>>) target_semaphore(%22 : memref<!tpu.dma_semaphore, #tpu.memory_space<semaphore_mem>>)
    }
    %c16_i32_1 = arith.constant 16 : i32
    %c0_i32_2 = arith.constant 0 : i32
    %c0_i32_3 = arith.constant 0 : i32
    %2 = arith.addi %c0_i32_2, %c0_i32_3 : i32
    %c1_i32_4 = arith.constant 1 : i32
    scf.for %arg5 = %c0_i32_2 to %2 step %c1_i32_4  : i32 {
      %c1_i32_10 = arith.constant 1 : i32
      %4 = arith.muli %arg5, %c1_i32_10 : i32
      %c16_i32_11 = arith.constant 16 : i32
      %5 = arith.addi %c16_i32_11, %4 : i32
      %c16_i32_12 = arith.constant 16 : i32
      %6 = arith.subi %5, %c16_i32_12 : i32
      %7 = arith.addi %0, %6 : i32
      %8 = arith.index_cast %7 : i32 to index
      %9 = memref.load %arg1[%8] : memref<16xi32, #tpu.memory_space<smem>>
      %c16_i32_13 = arith.constant 16 : i32
      %c0_i32_14 = arith.constant 0 : i32
      %10 = arith.cmpi eq, %c16_i32_13, %c0_i32_14 : i32
      %c1_i32_15 = arith.constant 1 : i32
      %11 = arith.select %10, %c1_i32_15, %c16_i32_13 : i32
      %12 = arith.remsi %6, %11 : i32
      %c0_i32_16 = arith.constant 0 : i32
      %13 = arith.cmpi ne, %12, %c0_i32_16 : i32
      %c0_i32_17 = arith.constant 0 : i32
      %14 = arith.cmpi slt, %12, %c0_i32_17 : i32
      %c0_i32_18 = arith.constant 0 : i32
      %15 = arith.cmpi slt, %11, %c0_i32_18 : i32
      %16 = arith.xori %14, %15 : i1
      %17 = arith.andi %16, %13 : i1
      %18 = arith.addi %12, %11 : i32
      %19 = arith.select %17, %18, %12 : i32
      %c0_i32_19 = arith.constant 0 : i32
      %20 = tpu.memref_slice %arg2[%9, %c0_i32_19] : memref<32x32xf32, #tpu.memory_space<vmem>> -> memref<1x32xf32, #tpu.memory_space<vmem>>
      %c0_i32_20 = arith.constant 0 : i32
      %21 = tpu.memref_slice %arg3[%6, %c0_i32_20] : memref<16x32xf32, #tpu.memory_space<vmem>> -> memref<1x32xf32, #tpu.memory_space<vmem>>
      %22 = tpu.memref_slice %arg4[%19] : memref<16x!tpu.dma_semaphore, #tpu.memory_space<semaphore_mem>> -> memref<1x!tpu.dma_semaphore, #tpu.memory_space<semaphore_mem>>
      %23 = tpu.memref_squeeze %22 : memref<1x!tpu.dma_semaphore, #tpu.memory_space<semaphore_mem>> -> memref<!tpu.dma_semaphore, #tpu.memory_space<semaphore_mem>>
      tpu.wait_dma2 semaphore(%23 : memref<!tpu.dma_semaphore, #tpu.memory_space<semaphore_mem>>) src(%20 : memref<1x32xf32, #tpu.memory_space<vmem>>) dst(%21 : memref<1x32xf32, #tpu.memory_space<vmem>>)
      %24 = arith.addi %0, %5 : i32
      %25 = arith.index_cast %24 : i32 to index
      %26 = memref.load %arg1[%25] : memref<16xi32, #tpu.memory_space<smem>>
      %c16_i32_21 = arith.constant 16 : i32
      %c0_i32_22 = arith.constant 0 : i32
      %27 = arith.cmpi eq, %c16_i32_21, %c0_i32_22 : i32
      %c1_i32_23 = arith.constant 1 : i32
      %28 = arith.select %27, %c1_i32_23, %c16_i32_21 : i32
      %29 = arith.remsi %5, %28 : i32
      %c0_i32_24 = arith.constant 0 : i32
      %30 = arith.cmpi ne, %29, %c0_i32_24 : i32
      %c0_i32_25 = arith.constant 0 : i32
      %31 = arith.cmpi slt, %29, %c0_i32_25 : i32
      %c0_i32_26 = arith.constant 0 : i32
      %32 = arith.cmpi slt, %28, %c0_i32_26 : i32
      %33 = arith.xori %31, %32 : i1
      %34 = arith.andi %33, %30 : i1
      %35 = arith.addi %29, %28 : i32
      %36 = arith.select %34, %35, %29 : i32
      %c0_i32_27 = arith.constant 0 : i32
      %37 = tpu.memref_slice %arg2[%26, %c0_i32_27] : memref<32x32xf32, #tpu.memory_space<vmem>> -> memref<1x32xf32, #tpu.memory_space<vmem>>
      %c0_i32_28 = arith.constant 0 : i32
      %38 = tpu.memref_slice %arg3[%5, %c0_i32_28] : memref<16x32xf32, #tpu.memory_space<vmem>> -> memref<1x32xf32, #tpu.memory_space<vmem>>
      %39 = tpu.memref_slice %arg4[%36] : memref<16x!tpu.dma_semaphore, #tpu.memory_space<semaphore_mem>> -> memref<1x!tpu.dma_semaphore, #tpu.memory_space<semaphore_mem>>
      %40 = tpu.memref_squeeze %39 : memref<1x!tpu.dma_semaphore, #tpu.memory_space<semaphore_mem>> -> memref<!tpu.dma_semaphore, #tpu.memory_space<semaphore_mem>>
      tpu.enqueue_dma source(%37 : memref<1x32xf32, #tpu.memory_space<vmem>>) target(%38 : memref<1x32xf32, #tpu.memory_space<vmem>>) target_semaphore(%40 : memref<!tpu.dma_semaphore, #tpu.memory_space<semaphore_mem>>)
    }
    %c0_i32_5 = arith.constant 0 : i32
    %c0_i32_6 = arith.constant 0 : i32
    %c16_i32_7 = arith.constant 16 : i32
    %3 = arith.addi %c0_i32_6, %c16_i32_7 : i32
    %c1_i32_8 = arith.constant 1 : i32
    scf.for %arg5 = %c0_i32_6 to %3 step %c1_i32_8  : i32 {
      %c1_i32_10 = arith.constant 1 : i32
      %4 = arith.muli %arg5, %c1_i32_10 : i32
      %c0_i32_11 = arith.constant 0 : i32
      %5 = arith.addi %c0_i32_11, %4 : i32
      %6 = arith.addi %0, %5 : i32
      %7 = arith.index_cast %6 : i32 to index
      %8 = memref.load %arg1[%7] : memref<16xi32, #tpu.memory_space<smem>>
      %c16_i32_12 = arith.constant 16 : i32
      %c0_i32_13 = arith.constant 0 : i32
      %9 = arith.cmpi eq, %c16_i32_12, %c0_i32_13 : i32
      %c1_i32_14 = arith.constant 1 : i32
      %10 = arith.select %9, %c1_i32_14, %c16_i32_12 : i32
      %11 = arith.remsi %5, %10 : i32
      %c0_i32_15 = arith.constant 0 : i32
      %12 = arith.cmpi ne, %11, %c0_i32_15 : i32
      %c0_i32_16 = arith.constant 0 : i32
      %13 = arith.cmpi slt, %11, %c0_i32_16 : i32
      %c0_i32_17 = arith.constant 0 : i32
      %14 = arith.cmpi slt, %10, %c0_i32_17 : i32
      %15 = arith.xori %13, %14 : i1
      %16 = arith.andi %15, %12 : i1
      %17 = arith.addi %11, %10 : i32
      %18 = arith.select %16, %17, %11 : i32
      %c0_i32_18 = arith.constant 0 : i32
      %19 = tpu.memref_slice %arg2[%8, %c0_i32_18] : memref<32x32xf32, #tpu.memory_space<vmem>> -> memref<1x32xf32, #tpu.memory_space<vmem>>
      %c0_i32_19 = arith.constant 0 : i32
      %20 = tpu.memref_slice %arg3[%5, %c0_i32_19] : memref<16x32xf32, #tpu.memory_space<vmem>> -> memref<1x32xf32, #tpu.memory_space<vmem>>
      %21 = tpu.memref_slice %arg4[%18] : memref<16x!tpu.dma_semaphore, #tpu.memory_space<semaphore_mem>> -> memref<1x!tpu.dma_semaphore, #tpu.memory_space<semaphore_mem>>
      %22 = tpu.memref_squeeze %21 : memref<1x!tpu.dma_semaphore, #tpu.memory_space<semaphore_mem>> -> memref<!tpu.dma_semaphore, #tpu.memory_space<semaphore_mem>>
      tpu.wait_dma2 semaphore(%22 : memref<!tpu.dma_semaphore, #tpu.memory_space<semaphore_mem>>) src(%19 : memref<1x32xf32, #tpu.memory_space<vmem>>) dst(%20 : memref<1x32xf32, #tpu.memory_space<vmem>>)
    }
    %c16_i32_9 = arith.constant 16 : i32
    return
  }
  func.func @transform_0(%arg0: i32, %arg1: memref<16xi32, #tpu.memory_space<smem>>) -> (i32, i32) {
    %c0_i32 = arith.constant 0 : i32
    %c0_i32_0 = arith.constant 0 : i32
    %c0_i32_1 = arith.constant 0 : i32
    return %c0_i32, %c0_i32_0 : i32, i32
  }
  func.func @transform_1(%arg0: i32, %arg1: memref<16xi32, #tpu.memory_space<smem>>) -> (i32, i32) {
    %c0_i32 = arith.constant 0 : i32
    %c0_i32_0 = arith.constant 0 : i32
    return %arg0, %c0_i32 : i32, i32
  }
}

</mosaic_0001>

<bundles_post_ra>
// kernel: tpu_custom_call.1
= control target key start
LH: loop header
LB: loop body
LE: loop exit
PB: predicated region body
PF: predicated region fallthrough
CT: control target
= control target key end

     0   :  { %s389_s9 = smov [#allocation4]   ;;  %s424_s0 = inlined_call_operand.hbm [shape: s32[16], index: 0, kind: input, shape index: {}]   ;;  %s425_s1 = inlined_call_operand.hbm [shape: f32[32,32], index: 1, kind: input, shape index: {}]   ;;  %s426_s2 = inlined_call_operand.hbm [shape: f32[16,32], index: 2, kind: output, shape index: {}]  }
   0x1   :  { %8 = dma.hbm_to_smem %s424_s0, 16, %s389_s9, [#allocation3] }
   0x2   :  { %373 = dma.done.wait [#allocation3], 16 }
   0x3   :  { %374 = vsyncadd [#allocation3], 4294967280 }
   0x4   :  { %10 = sfence }
   0x5   :  { %11 = vsyncpa [#allocation6], 0 }
   0x6   :  { %12 = vsyncpa [#allocation7], 0  ;;  %s390_s12 = smov [#allocation5]  }
   0x7   :  { %s18_s13 = sshll.u32 %s390_s12, 4  ;;  %s19_s13 = int_to_ptr.vmem [resolvable:$true] %s18_s13 }
   0x8   :  { %s333_s14 = scalar_lea.vmem %s19_s13, 512  ;;  %p338_p1 = scmp.lt.s32.totalorder %s19_s13, %s19_s13 }
   0x9   :  { %p334_p0 = scmp.ne.s32.totalorder %s19_s13, %s333_s14  ;;  %p339_p2 = scmp.lt.s32.totalorder %s333_s14, %s333_s14 }
   0xb   :  { %p340_p3 = por %p339_p2, %p338_p1 }
   0xd   :  { %p341_p4 = pnand %p340_p3, %p334_p0 }
   0xf   :  { %344 = shalt.err (!%p341_p4)
}
  0x10   :  { %s391_s15 = smov 128   ;;  %s392_s16 = smov 8  }
  0x11   :  { %24 = dma.hbm_to_vmem [thread:$0]  %s425_s1, 512, %s19_s13, [#allocation6], %s391_s15, %s391_s15, %s392_s16  }
  0x12   :  { %375 = dma.done.wait [#allocation6], 512  }
  0x13   :  { %376 = vsyncadd [#allocation6], 4294966784  ;;  %s381_s18 = smov 0  }
  0x14 LB: > { %s36_s19 = sld [smem:[#allocation4 + %s383_s18]]  ;;  %p37_p5 = scmp.lt.s32.totalorder %s383_s18, 0  ;;  %s383_s18 = sphi %s381_s18, %s34_s18  }
  0x15   : > { %s38_s20 = ssub.s32 0, %s383_s18  ;;  %s50_s26 = scalar_lea.vmem [#allocation8], %s383_s18 }
  0x16   : > { %s274_s21 = smin.u32 %s383_s18, %s38_s20 }
  0x17   : > { %s40_s22 = sand.u32 15, %s274_s21  }
  0x18   : > { %s41_s23 = ssub.s32 0, %s40_s22 }
  0x19   : > { %s428_s23 = smov (!%p37_p5, %s41_s23), %s40_s22 }
  0x1a   : > { %p276_p6 = scmp.lt.s32.totalorder %s428_s23, 0  ;;  %s47_s24 = sadd.s32 16, %s428_s23 }
  0x1b   : > { %s49_s25 = scalar_lea.vmem [#allocation5], %s36_s19 }
  0x1c   : > { %v70_v0 = vld [vmem:[%s49_s25] sm:$0x1]  ;;  %s430_s24 = smov (!%p276_p6, %s47_s24), %s428_s23 }
  0x1d   : > { %71 = vst [vmem:[%s50_s26] sm:$0x1] %v70_v0  ;;  %s51_s1 = scalar_lea.sflag [#allocation2], %s430_s24 }
  0x1e   : > { %97 = vsyncadd %s51_s1, 16  ;;  %s34_s18 = sadd.s32 1, %s383_s18  }
  0x1f   : > { %p31_p7 = scmp.ge.s32.totalorder %s34_s18, 16  }
  0x20   :  { %s385_s27 = smov (%p31_p7), 0  }
  0x21   :  { %33 = sbr.rel (!%p31_p7) target bundleno = 20 (0x14), region = 101 }
  0x26 LB: > { %p106_p8 = scmp.lt.s32.totalorder %s387_s27, 0  ;;  %s107_s28 = ssub.s32 0, %s387_s27  ;;  %s387_s27 = sphi %s385_s27, %s103_s27  }
  0x27   : > { %s277_s29 = smin.u32 %s387_s27, %s107_s28 }
  0x28   : > { %s109_s30 = sand.u32 15, %s277_s29  }
  0x29   : > { %s110_s3 = ssub.s32 0, %s109_s30 }
  0x2a   : > { %s432_s3 = smov (!%p106_p8, %s110_s3), %s109_s30 }
  0x2b   : > { %p279_p9 = scmp.lt.s32.totalorder %s432_s3, 0  ;;  %s116_s4 = sadd.s32 16, %s432_s3 }
  0x2d   : > { %s434_s4 = smov (!%p279_p9, %s116_s4), %s432_s3 }
  0x2e   : > { %s118_s5 = scalar_lea.sflag [#allocation2], %s434_s4 }
  0x2f   : > { %377 = dma.done.wait %s118_s5, 16 }
  0x30   : > { %378 = vsyncadd %s118_s5, 4294967280  ;;  %s103_s27 = sadd.s32 1, %s387_s27  }
  0x31   : > { %p100_p10 = scmp.ge.s32.totalorder %s103_s27, 16  }
  0x32   :  { %s393_s6 = smov (%p100_p10), [#allocation8]  }
  0x33   :  { %102 = sbr.rel (!%p100_p10) target bundleno = 38 (0x26), region = 112  ;;  %s127_s7 = sshll.u32 (%p100_p10), %s393_s6, 4  ;;  %s128_s7 = int_to_ptr.vmem [resolvable:$true] %s127_s7 }
  0x34   :  { %s345_s8 = scalar_lea.vmem (%p100_p10), %s128_s7, 256  ;;  %p350_p12 = scmp.lt.s32.totalorder (%p100_p10), %s128_s7, %s128_s7 }
  0x35   :  { %p346_p11 = scmp.ne.s32.totalorder (%p100_p10), %s128_s7, %s345_s8  ;;  %p351_p13 = scmp.lt.s32.totalorder (%p100_p10), %s345_s8, %s345_s8 }
  0x37   :  { %p352_p0 = por (%p100_p10), %p351_p13, %p350_p12 }
  0x39   :  { %p353_p1 = pnand %p352_p0, %p346_p11 }
  0x3b   :  { %356 = shalt.err (!%p353_p1)
}
  0x3c   :  { %133 = dma.vmem_to_hbm [thread:$0]  %s128_s7, 256, %s426_s2, [#allocation7], %s391_s15, %s391_s15, %s392_s16  }
  0x3d   :  { %379 = dma.done.wait [#allocation7], 256  }
  0x3e   :  { %380 = vsyncadd [#allocation7], 4294967040 }
  0x3f   :  { %137 = vsyncpa [#allocation6], 1 }
  0x40   :  { %138 = vsyncpa [#allocation7], 1 }
  0x41   :  { %139 = vsyncmov [#allocation2] }
  0x44   :  { %s140_s11 = vpop.sfrf %139 }
  0x45   :  { %p280_p2 = scmp.ne.s32.totalorder %s140_s11, 0 }
  0x47   :  { %144 = shalt.err (%p280_p2)  }
  0x48   :  { %146 = vsyncmov [#allocation2 + $0x1] }
  0x4b   :  { %s147_s12 = vpop.sfrf %146 }
  0x4c   :  { %p281_p3 = scmp.ne.s32.totalorder %s147_s12, 0 }
  0x4e   :  { %151 = shalt.err (%p281_p3)  }
  0x4f   :  { %153 = vsyncmov [#allocation2 + $0x2] }
  0x52   :  { %s154_s13 = vpop.sfrf %153 }
  0x53   :  { %p282_p4 = scmp.ne.s32.totalorder %s154_s13, 0 }
  0x55   :  { %158 = shalt.err (%p282_p4)  }
  0x56   :  { %160 = vsyncmov [#allocation2 + $0x3] }
  0x59   :  { %s161_s14 = vpop.sfrf %160 }
  0x5a   :  { %p283_p5 = scmp.ne.s32.totalorder %s161_s14, 0 }
  0x5c   :  { %165 = shalt.err (%p283_p5)  }
  0x5d   :  { %167 = vsyncmov [#allocation2 + $0x4] }
  0x60   :  { %s168_s2 = vpop.sfrf %167 }
  0x61   :  { %p284_p6 = scmp.ne.s32.totalorder %s168_s2, 0 }
  0x63   :  { %172 = shalt.err (%p284_p6)  }
  0x64   :  { %174 = vsyncmov [#allocation2 + $0x5] }
  0x67   :  { %s175_s15 = vpop.sfrf %174 }
  0x68   :  { %p285_p7 = scmp.ne.s32.totalorder %s175_s15, 0 }
  0x6a   :  { %179 = shalt.err (%p285_p7)  }
  0x6b   :  { %181 = vsyncmov [#allocation2 + $0x6] }
  0x6e   :  { %s182_s16 = vpop.sfrf %181 }
  0x6f   :  { %p286_p8 = scmp.ne.s32.totalorder %s182_s16, 0 }
  0x71   :  { %186 = shalt.err (%p286_p8)  }
  0x72   :  { %188 = vsyncmov [#allocation2 + $0x7] }
  0x75   :  { %s189_s0 = vpop.sfrf %188 }
  0x76   :  { %p287_p9 = scmp.ne.s32.totalorder %s189_s0, 0 }
  0x78   :  { %193 = shalt.err (%p287_p9)  }
  0x79   :  { %195 = vsyncmov [#allocation2 + $0x8] }
  0x7c   :  { %s196_s17 = vpop.sfrf %195 }
  0x7d   :  { %p288_p10 = scmp.ne.s32.totalorder %s196_s17, 0 }
  0x7f   :  { %200 = shalt.err (%p288_p10)  }
  0x80   :  { %202 = vsyncmov [#allocation2 + $0x9] }
  0x83   :  { %s203_s18 = vpop.sfrf %202 }
  0x84   :  { %p289_p11 = scmp.ne.s32.totalorder %s203_s18, 0 }
  0x86   :  { %207 = shalt.err (%p289_p11)  }
  0x87   :  { %209 = vsyncmov [#allocation2 + $0xa] }
  0x8a   :  { %s210_s19 = vpop.sfrf %209 }
  0x8b   :  { %p290_p12 = scmp.ne.s32.totalorder %s210_s19, 0 }
  0x8d   :  { %214 = shalt.err (%p290_p12)  }
  0x8e   :  { %216 = vsyncmov [#allocation2 + $0xb] }
  0x91   :  { %s217_s20 = vpop.sfrf %216 }
  0x92   :  { %p291_p13 = scmp.ne.s32.totalorder %s217_s20, 0 }
  0x94   :  { %221 = shalt.err (%p291_p13)  }
  0x95   :  { %223 = vsyncmov [#allocation2 + $0xc] }
  0x98   :  { %s224_s21 = vpop.sfrf %223 }
  0x99   :  { %p292_p0 = scmp.ne.s32.totalorder %s224_s21, 0 }
  0x9b   :  { %228 = shalt.err (%p292_p0)  }
  0x9c   :  { %230 = vsyncmov [#allocation2 + $0xd] }
  0x9f   :  { %s231_s22 = vpop.sfrf %230 }
  0xa0   :  { %p293_p1 = scmp.ne.s32.totalorder %s231_s22, 0 }
  0xa2   :  { %235 = shalt.err (%p293_p1)  }
  0xa3   :  { %237 = vsyncmov [#allocation2 + $0xe] }
  0xa6   :  { %s238_s23 = vpop.sfrf %237 }
  0xa7   :  { %p294_p2 = scmp.ne.s32.totalorder %s238_s23, 0 }
  0xa9   :  { %242 = shalt.err (%p294_p2)  }
  0xaa   :  { %244 = vsyncmov [#allocation2 + $0xf] }
  0xad   :  { %s245_s24 = vpop.sfrf %244 }
  0xae   :  { %p295_p3 = scmp.ne.s32.totalorder %s245_s24, 0 }
  0xb0   :  { %249 = shalt.err (%p295_p3)  }

</bundles_post_ra>
